<compile_context>
chip_gen: v7x
topology: tpu7x:2x2x1
jax: 0.10.0
libtpu: 0.0.40
codegen_flags: <defaults>
</compile_context>

<pallas_src>
import jax
import jax.numpy as jnp
from jax.experimental import pallas as pl
from jax.experimental.pallas import tpu as pltpu


def _locked_dropout_kernel(x_ref, mask_ref, o_ref):
    # x_ref: (TT, BH), mask_ref: (1, BH) holding 0 or 1/keep_prob.
    o_ref[...] = (x_ref[...] * mask_ref[...]).astype(o_ref.dtype)


def _tile_target_bytes():
    """Per-generation target bytes for one (TT, BH) input tile."""
    try:
        kind = jax.devices()[0].device_kind.lower()
    except Exception:  # pragma: no cover - defensive
        kind = ""
    if "v7" in kind:
        return 8 << 20            # 3.2 TB/s HBM: amortize the ~0.35 us/step
    if "v6" in kind:
        return 4 << 20            # measured ~85% of roofline at 1-4 MiB tiles
    if "v5" in kind:
        return 3 << 20            # per-step DMA already ~5 us; modest tiles
    return 4 << 20


def _is_v5():
    try:
        return "v5" in jax.devices()[0].device_kind.lower()
    except Exception:  # pragma: no cover - defensive
        return False


def _choose_time_tile(T, row_bytes, itemsize, target_bytes):
    """Pick a time tile: ~target_bytes per block, dtype-aware sublane multiple,
    and (when T allows) at least ~4 grid steps so pipelining stays engaged."""
    sub = max(8, 32 // max(1, itemsize))      # 8 rows f32, 16 bf16, 32 int8/fp8
    if T <= sub:
        return T                              # tiny T: single (full-dim) block
    tt = max(1, target_bytes // max(1, row_bytes))
    if T >= 4 * sub:
        tt = min(tt, T // 4)                  # keep >= ~4 grid steps
    tt = max(sub, (tt // sub) * sub)          # sublane-multiple tile rows
    return min(tt, T)


def locked_dropout(x, key, dropout=0.5, training=True):
    """Forward pass of LockedDropout.

    x:   (T, B, H) array.
    key: jax.random key used to draw the (1, B, H) mask.
    """
    if (not training) or dropout == 0.0:
        return x

    keep_prob = 1.0 - float(dropout)
    T, B, H = x.shape
    BH = B * H
    itemsize = jnp.dtype(x.dtype).itemsize

    # Lane-dense layout: flatten (B, H) -> BH.  No padding: the BlockSpec's
    # last dim equals the full array dim, so Pallas handles the <128-lane tail
    # with masked stores inside the kernel (no extra HBM passes).
    x2 = x.reshape(T, BH)

    # One (1, BH) mask shared across all time steps, pre-scaled by 1/keep_prob.
    # Use f32 unless x is bf16 on a chip with a bf16 VPU (v6e/v7x).
    mask_dtype = x.dtype if (x.dtype == jnp.bfloat16 and not _is_v5()) else jnp.float32
    keep = jax.random.bernoulli(key, p=keep_prob, shape=(1, BH))
    mask = (keep.astype(mask_dtype) * jnp.asarray(1.0 / keep_prob, mask_dtype))

    TT = _choose_time_tile(T, BH * itemsize, itemsize, _tile_target_bytes())
    grid = (pl.cdiv(T, TT),)

    out2 = pl.pallas_call(
        _locked_dropout_kernel,
        out_shape=jax.ShapeDtypeStruct((T, BH), x.dtype),
        grid=grid,
        in_specs=[
            pl.BlockSpec((TT, BH), lambda i: (i, 0)),   # x: streams over T
            pl.BlockSpec((1, BH), lambda i: (0, 0)),    # mask: resident in VMEM
        ],
        out_specs=pl.BlockSpec((TT, BH), lambda i: (i, 0)),
        compiler_params=pltpu.CompilerParams(
            dimension_semantics=("parallel",),          # shard T across TCs (v7x)
            vmem_limit_bytes=48 * 1024 * 1024,          # fits 8 MiB tiles, <64 MiB
        ),
        cost_estimate=pl.CostEstimate(
            flops=T * BH,
            transcendentals=0,
            bytes_accessed=2 * T * BH * itemsize + BH * jnp.dtype(mask_dtype).itemsize),
    )(x2, mask)

    return out2.reshape(T, B, H)


if __name__ == "__main__":
    root = jax.random.PRNGKey(0)
    k_x, k_mask = jax.random.split(root)

    # B*H = 96 (not a multiple of 128) to exercise the no-padding / masked-tail
    # store path from the perf review.
    T, B, H = 8, 4, 24
    x = jax.random.normal(k_x, (T, B, H), dtype=jnp.float32)

    y = jax.block_until_ready(locked_dropout(x, k_mask, dropout=0.5, training=True))

    # 1) every output element is either 0 or x / keep_prob (keep_prob=0.5 -> 2x)
    ratio = jnp.where(x != 0, y / x, 0.0)
    ok_vals = jnp.all((jnp.abs(ratio) < 1e-6) | (jnp.abs(ratio - 2.0) < 1e-4))
    # 2) the dropout pattern is identical across the time axis (locked)
    m0 = (y[0] != 0)
    ok_locked = jnp.all(jnp.stack([(y[t] != 0) == m0 for t in range(T)]))
    # 3) eval mode / dropout=0 are identity
    y_eval = jax.block_until_ready(locked_dropout(x, k_mask, training=False))
    y_zero = jax.block_until_ready(locked_dropout(x, k_mask, dropout=0.0))
    ok_eval = jnp.allclose(y_eval, x) and jnp.allclose(y_zero, x)

    assert bool(ok_vals) and bool(ok_locked) and bool(ok_eval)
    print("KERNEL_OK")
</pallas_src>

<mosaic_0001>
module attributes {stable_mosaic.version = 11 : i64} {
  func.func @_locked_dropout_kernel(%arg0: i32, %arg1: memref<8x96xf32, #tpu.memory_space<vmem>>, %arg2: memref<1x96xf32, #tpu.memory_space<vmem>>, %arg3: memref<8x96xf32, #tpu.memory_space<vmem>>) attributes {dimension_semantics = [#tpu.dimension_semantics<parallel>], iteration_bounds = array<i64: 1>, scalar_prefetch = 0 : i64, scratch_operands = 0 : i64, tpu.core_type = #tpu.core_type<tc>, window_params = [{transform_indices = @transform_0, window_bounds = array<i64: 8, 96>}, {pipeline_mode = #tpu.pipeline_mode<synchronous>, transform_indices = @transform_1, window_bounds = array<i64: 1, 96>}, {transform_indices = @transform_2, window_bounds = array<i64: 8, 96>}]} {
    %c0 = arith.constant 0 : index
    %c0_0 = arith.constant 0 : index
    %0 = vector.load %arg1[%c0, %c0_0] : memref<8x96xf32, #tpu.memory_space<vmem>>, vector<8x96xf32>
    %c0_1 = arith.constant 0 : index
    %c0_2 = arith.constant 0 : index
    %1 = vector.load %arg2[%c0_1, %c0_2] : memref<1x96xf32, #tpu.memory_space<vmem>>, vector<1x96xf32>
    %2 = vector.broadcast %1 : vector<1x96xf32> to vector<8x96xf32>
    %3 = arith.mulf %0, %2 : vector<8x96xf32>
    %c0_3 = arith.constant 0 : index
    %c0_4 = arith.constant 0 : index
    %4 = vector.load %arg3[%c0_3, %c0_4] : memref<8x96xf32, #tpu.memory_space<vmem>>, vector<8x96xf32>
    tpu.vector_store %arg3[%c0_3, %c0_4], %3 {strides = array<i32>} : memref<8x96xf32, #tpu.memory_space<vmem>>, vector<8x96xf32>,
    return
  }
  func.func @transform_0(%arg0: i32) -> (i32, i32) {
    %c0_i32 = arith.constant 0 : i32
    %c0_i32_0 = arith.constant 0 : i32
    return %arg0, %c0_i32 : i32, i32
  }
  func.func @transform_1(%arg0: i32) -> (i32, i32) {
    %c0_i32 = arith.constant 0 : i32
    %c0_i32_0 = arith.constant 0 : i32
    %c0_i32_1 = arith.constant 0 : i32
    return %c0_i32, %c0_i32_0 : i32, i32
  }
  func.func @transform_2(%arg0: i32) -> (i32, i32) {
    %c0_i32 = arith.constant 0 : i32
    %c0_i32_0 = arith.constant 0 : i32
    return %arg0, %c0_i32 : i32, i32
  }
}

</mosaic_0001>

<bundles_post_ra>
// kernel: tpu_custom_call.1
= control target key start
LH: loop header
LB: loop body
LE: loop exit
PB: predicated region body
PF: predicated region fallthrough
CT: control target
= control target key end

     0   :  { %7 = vsyncpa [#allocation3], 0  ;;  %s145_s0 = inlined_call_operand.hbm [shape: f32[8,96], index: 0, kind: input, shape index: {}]   ;;  %s146_s1 = inlined_call_operand.vmem [shape: f32[1,96], index: 1, kind: input, shape index: {}]   ;;  %s147_s2 = inlined_call_operand.hbm [shape: f32[8,96], index: 2, kind: output, shape index: {}]  }
   0x1   :  { %8 = vsyncpa [#allocation4], 0  ;;  %s101_s9 = smov [#allocation2]   ;;  %s53_s13 = scalar_lea.hbm %s145_s0, 128 }
   0x2   :  { %s15_s10 = sshll.u32 %s101_s9, 4  ;;  %p54_p0 = scmp.ne.s32.totalorder %s145_s0, %s53_s13  ;;  %s16_s10 = int_to_ptr.vmem [resolvable:$true] %s15_s10 }
   0x3   :  { %p57_p1 = scmp.lt.u32.totalorder %s53_s13, %s145_s0 }
   0x5   :  { %p59_p2 = pnand %p57_p1, %p54_p0 }
   0x7   :  { %62 = shalt.err (!%p59_p2)
}
   0x8   :  { %s63_s18 = scalar_lea.vmem %s16_s10, 128  ;;  %p68_p4 = scmp.lt.s32.totalorder %s16_s10, %s16_s10 }
   0x9   :  { %p64_p3 = scmp.ne.s32.totalorder %s16_s10, %s63_s18  ;;  %p69_p5 = scmp.lt.s32.totalorder %s63_s18, %s63_s18 }
   0xb   :  { %p70_p6 = por %p69_p5, %p68_p4 }
   0xd   :  { %p71_p7 = pnand %p70_p6, %p64_p3 }
   0xf   :  { %74 = shalt.err (!%p71_p7)
}
  0x10   :  { %18 = dma.hbm_to_vmem [thread:$0]  %s145_s0, 128, %s16_s10, [#allocation3]  }
  0x11   :  { %97 = dma.done.wait [#allocation3], 128  }
  0x12   :  { %98 = vsyncadd [#allocation3], 4294967168  ;;  %s102_s21 = smov [#allocation5]   ;;  %v24_v0 = vld [vmem:[#allocation2] sm:$0xff]  ;;  %vm33_vm0 = vcmask 785408  }
  0x13   :  { %s41_s22 = sshll.u32 %s102_s21, 4  ;;  %v50_v1 = vld [vmem:[%s146_s1] ss:$0 sm:$0xff]  ;;  %s42_s22 = int_to_ptr.vmem [resolvable:$true] %s41_s22 }
  0x14   :  { %v32_v2 = vmul.f32 %v50_v1, %v24_v0  ;;  %s75_s25 = scalar_lea.vmem %s42_s22, 128  ;;  %p80_p9 = scmp.lt.s32.totalorder %s42_s22, %s42_s22 }
  0x15   :  { %p76_p8 = scmp.ne.s32.totalorder %s42_s22, %s75_s25  ;;  %p81_p10 = scmp.lt.s32.totalorder %s75_s25, %s75_s25 }
  0x16   :  { %34 = vst.msk [vmem:[#allocation5] sm:$0xff] %vm33_vm0, %v32_v2 }
  0x17   :  { %p82_p11 = por %p81_p10, %p80_p9 }
  0x19   :  { %p83_p12 = pnand %p82_p11, %p76_p8 }
  0x1b   :  { %86 = shalt.err (!%p83_p12)
}
  0x1c   :  { %s87_s27 = scalar_lea.hbm %s147_s2, 128 }
  0x1d   :  { %p88_p13 = scmp.ne.s32.totalorder %s147_s2, %s87_s27  ;;  %p91_p0 = scmp.lt.u32.totalorder %s87_s27, %s147_s2 }
  0x1f   :  { %p93_p1 = pnand %p91_p0, %p88_p13 }
  0x21   :  { %96 = shalt.err (!%p93_p1)
}
  0x22   :  { %44 = dma.vmem_to_hbm [thread:$0]  %s42_s22, 128, %s147_s2, [#allocation4]  }
  0x23   :  { %99 = dma.done.wait [#allocation4], 128  }
  0x24   :  { %100 = vsyncadd [#allocation4], 4294967168 }
  0x25   :  { %48 = vsyncpa [#allocation3], 1 }
  0x26   :  { %49 = vsyncpa [#allocation4], 1 }

</bundles_post_ra>
